<compile_context>
chip_gen: v7x
topology: tpu7x:2x2x1
jax: 0.10.0
libtpu: 0.0.40
codegen_flags: <defaults>
</compile_context>

<pallas_src>
import math

import jax
import jax.numpy as jnp
from jax.experimental import pallas as pl
from jax.experimental.pallas import tpu as pltpu


def _elu(x):
    # ELU(alpha=1), forward-only: jnp.where discards the exp branch for x > 0,
    # so no clamp is needed (saves one VALU op per element).
    return jnp.where(x > 0, x, jnp.exp(x) - 1.0)


def _ddpg_q_kernel(obs_ref, act_ref,
                   w1_ref, b1_ref,
                   w2o_ref, w2a_ref, b2_ref,
                   w3_ref, b3_ref,
                   out_ref):
    # ---- mlp1: Linear + ELU (activate_last_layer=True) ----------------------
    # bf16 operands on the MXU, f32 accumulation.
    obs_bf = obs_ref[...].astype(jnp.bfloat16)
    h1 = jnp.dot(obs_bf, w1_ref[...],
                 preferred_element_type=jnp.float32) + b1_ref[...]
    h1 = _elu(h1)                                               # (bt, 512) f32

    # ---- mlp2 layer 0 on cat([h1, action], -1) (concat-free form) -----------
    h1_bf = h1.astype(jnp.bfloat16)
    act_bf = act_ref[...].astype(jnp.bfloat16)
    h2 = (jnp.dot(h1_bf, w2o_ref[...], preferred_element_type=jnp.float32)
          + jnp.dot(act_bf, w2a_ref[...], preferred_element_type=jnp.float32)
          + b2_ref[...])
    h2 = _elu(h2)                                               # (bt, 384) f32

    # ---- mlp2 last layer: Linear(300, 1) -------------------------------------
    # N=1 output: keep it off the MXU. VPU multiply + lane reduce against the
    # f32 w3 row vector (padded lanes of h2 and w3 are zero -> exact).
    v = jnp.sum(h2 * w3_ref[...], axis=-1, keepdims=True) + b3_ref[...]
    out_ref[...] = v.astype(out_ref.dtype)                      # (bt, 1)


def _round_up(n, m):
    return ((n + m - 1) // m) * m


def _choose_row_tile(B):
    """Batch-row tile: whole batch when tiny; otherwise a multiple of 8 rows
    giving at least 2 grid steps (so v7x's two TensorCores both get work),
    capped at 512 rows to match MXU tiling and amortize per-step overhead."""
    if B <= 8:
        return B
    return min(512, _round_up(pl.cdiv(B, 2), 8))


def ddpg_qnet_forward(padded_params, observation, action):
    """observation: [B, F], action: [B, A] (float32). Returns value [B, 1]."""
    B, F = observation.shape
    A = action.shape[-1]
    H1P = padded_params["w1"].shape[1]       # 400 -> 512
    H2P = padded_params["w2_obs"].shape[1]   # 300 -> 384

    bt = _choose_row_tile(B)
    Bp = _round_up(B, bt)
    if Bp != B:
        # zero-pad the batch tail instead of hard-failing on odd batch sizes
        observation = jnp.pad(observation, ((0, Bp - B), (0, 0)))
        action = jnp.pad(action, ((0, Bp - B), (0, 0)))
    grid = (Bp // bt,)

    def resident(shape):
        # weights / biases: same block every grid step (stay resident in VMEM)
        return pl.BlockSpec(shape, lambda i: (0, 0))

    in_specs = [
        pl.BlockSpec((bt, F), lambda i: (i, 0)),     # observation rows
        pl.BlockSpec((bt, A), lambda i: (i, 0)),     # action rows
        resident((F, H1P)), resident((1, H1P)),      # w1 (bf16), b1 (f32)
        resident((H1P, H2P)), resident((A, H2P)),    # w2_obs, w2_act (bf16)
        resident((1, H2P)),                          # b2 (f32)
        resident((1, H2P)), resident((1, 1)),        # w3 row (f32), b3 (f32)
    ]
    out_specs = pl.BlockSpec((bt, 1), lambda i: (i, 0))

    out = pl.pallas_call(
        _ddpg_q_kernel,
        grid=grid,
        in_specs=in_specs,
        out_specs=out_specs,
        out_shape=jax.ShapeDtypeStruct((Bp, 1), observation.dtype),
        compiler_params=pltpu.CompilerParams(
            dimension_semantics=("parallel",)),
    )(observation, action,
      padded_params["w1"], padded_params["b1"],
      padded_params["w2_obs"], padded_params["w2_act"], padded_params["b2"],
      padded_params["w3_row"], padded_params["b3"])
    return out[:B]


# ----------------------------- parameter helpers ------------------------------
def init_params(key, obs_features, action_features,
                net1_out=400, net2_hidden=300):
    """Synthetic weights matching PyTorch defaults (uniform(-1/sqrt(fan_in)))
    and ddpg_init_last_layer(scale=0.006) for the final layer."""
    keys = iter(jax.random.split(key, 6))
    p = {}
    # mlp1: Linear(F, 400)
    b = 1.0 / math.sqrt(obs_features)
    p["w1"] = jax.random.uniform(next(keys), (obs_features, net1_out),
                                 jnp.float32, -b, b)
    p["b1"] = jax.random.uniform(next(keys), (net1_out,), jnp.float32, -b, b)
    # mlp2 layer 0: Linear(400 + A, 300)
    fan_in = net1_out + action_features
    b = 1.0 / math.sqrt(fan_in)
    p["w2"] = jax.random.uniform(next(keys), (fan_in, net2_hidden),
                                 jnp.float32, -b, b)
    p["b2"] = jax.random.uniform(next(keys), (net2_hidden,), jnp.float32, -b, b)
    # mlp2 last layer: Linear(300, 1), ddpg_init_last_layer scale=0.006
    scale = 0.006
    p["w3"] = jax.random.uniform(next(keys), (net2_hidden, 1),
                                 jnp.float32, -scale / 2, scale / 2)
    p["b3"] = jax.random.uniform(next(keys), (1,), jnp.float32,
                                 -scale / 2, scale / 2)
    return p


def pad_params(params, matmul_dtype=jnp.bfloat16):
    """One-time padding of hidden dims to 128 multiples, concat-free split of
    w2, bf16 pre-cast of matmul weights, and w3 stored as an f32 row vector
    (so the N=1 layer runs on the VPU). Padded lanes are zero -> exact."""
    F, H1 = params["w1"].shape
    fan2, H2 = params["w2"].shape
    A = fan2 - H1
    H1P, H2P = _round_up(H1, 128), _round_up(H2, 128)

    def pad2(w, rows, cols):
        return jnp.pad(w, ((0, rows - w.shape[0]), (0, cols - w.shape[1])))

    return {
        "w1": pad2(params["w1"], F, H1P).astype(matmul_dtype),
        "b1": jnp.pad(params["b1"], (0, H1P - H1)).reshape(1, H1P),
        "w2_obs": pad2(params["w2"][:H1], H1P, H2P).astype(matmul_dtype),
        "w2_act": pad2(params["w2"][H1:], A, H2P).astype(matmul_dtype),
        "b2": jnp.pad(params["b2"], (0, H2P - H2)).reshape(1, H2P),
        "w3_row": jnp.pad(params["w3"][:, 0], (0, H2P - H2)).reshape(1, H2P),
        "b3": params["b3"].reshape(1, 1),
    }


def _reference_forward(params, observation, action):
    """Pure-JAX f32 reference of DdpgMlpQNet.forward with unpadded weights."""
    h1 = _elu(observation @ params["w1"] + params["b1"])
    x2 = jnp.concatenate([h1, action], axis=-1)
    h2 = _elu(x2 @ params["w2"] + params["b2"])
    return h2 @ params["w3"] + params["b3"]


if __name__ == "__main__":
    batch, obs_features, action_features = 2, 16, 4

    key = jax.random.PRNGKey(0)
    k_params, k_obs, k_act = jax.random.split(key, 3)
    params = init_params(k_params, obs_features, action_features)
    padded = pad_params(params)

    observation = jax.random.normal(k_obs, (batch, obs_features), jnp.float32)
    action = jax.random.normal(k_act, (batch, action_features), jnp.float32)

    value = jax.block_until_ready(ddpg_qnet_forward(padded, observation, action))

    # correctness check against the pure-JAX f32 (unpadded) reference;
    # tolerance relaxed because matmul operands are bf16 (f32 accumulation).
    v_ref = _reference_forward(params, observation, action)
    assert value.shape == (batch, 1)
    assert jnp.allclose(value, v_ref, atol=5e-3, rtol=5e-2), (value, v_ref)

    print("KERNEL_OK")
</pallas_src>

<mosaic_0001>
module attributes {stable_mosaic.version = 11 : i64} {
  func.func @_ddpg_q_kernel(%arg0: i32, %arg1: memref<2x16xf32, #tpu.memory_space<vmem>>, %arg2: memref<2x4xf32, #tpu.memory_space<vmem>>, %arg3: memref<16x512xbf16, #tpu.memory_space<vmem>>, %arg4: memref<1x512xf32, #tpu.memory_space<vmem>>, %arg5: memref<512x384xbf16, #tpu.memory_space<vmem>>, %arg6: memref<4x384xbf16, #tpu.memory_space<vmem>>, %arg7: memref<1x384xf32, #tpu.memory_space<vmem>>, %arg8: memref<1x384xf32, #tpu.memory_space<vmem>>, %arg9: memref<1x1xf32, #tpu.memory_space<vmem>>, %arg10: memref<2x1xf32, #tpu.memory_space<vmem>>) attributes {dimension_semantics = [#tpu.dimension_semantics<parallel>], iteration_bounds = array<i64: 1>, scalar_prefetch = 0 : i64, scratch_operands = 0 : i64, tpu.core_type = #tpu.core_type<tc>, window_params = [{transform_indices = @transform_0, window_bounds = array<i64: 2, 16>}, {transform_indices = @transform_1, window_bounds = array<i64: 2, 4>}, {pipeline_mode = #tpu.pipeline_mode<synchronous>, transform_indices = @transform_2, window_bounds = array<i64: 16, 512>}, {pipeline_mode = #tpu.pipeline_mode<synchronous>, transform_indices = @transform_3, window_bounds = array<i64: 1, 512>}, {pipeline_mode = #tpu.pipeline_mode<synchronous>, transform_indices = @transform_4, window_bounds = array<i64: 512, 384>}, {pipeline_mode = #tpu.pipeline_mode<synchronous>, transform_indices = @transform_5, window_bounds = array<i64: 4, 384>}, {pipeline_mode = #tpu.pipeline_mode<synchronous>, transform_indices = @transform_6, window_bounds = array<i64: 1, 384>}, {pipeline_mode = #tpu.pipeline_mode<synchronous>, transform_indices = @transform_7, window_bounds = array<i64: 1, 384>}, {pipeline_mode = #tpu.pipeline_mode<synchronous>, transform_indices = @transform_8, window_bounds = array<i64: 1, 1>}, {transform_indices = @transform_9, window_bounds = array<i64: 2, 1>}]} {
    %c0 = arith.constant 0 : index
    %c0_0 = arith.constant 0 : index
    %0 = vector.load %arg1[%c0, %c0_0] : memref<2x16xf32, #tpu.memory_space<vmem>>, vector<2x16xf32>
    %1 = arith.truncf %0 : vector<2x16xf32> to vector<2x16xbf16>
    %c0_1 = arith.constant 0 : index
    %c0_2 = arith.constant 0 : index
    %2 = vector.load %arg3[%c0_1, %c0_2] : memref<16x512xbf16, #tpu.memory_space<vmem>>, vector<16x512xbf16>
    %cst = arith.constant dense<0.000000e+00> : vector<2x512xf32>
    %3 = tpu.matmul %1, %2, %cst {dimension_numbers = #tpu.dot_dimension_numbers<[1], [0], [0], [1], [0, 0, 1, 1], [], []>} : vector<2x16xbf16>, vector<16x512xbf16>, vector<2x512xf32> -> vector<2x512xf32>
    %c0_3 = arith.constant 0 : index
    %c0_4 = arith.constant 0 : index
    %4 = vector.load %arg4[%c0_3, %c0_4] : memref<1x512xf32, #tpu.memory_space<vmem>>, vector<1x512xf32>
    %5 = vector.broadcast %4 : vector<1x512xf32> to vector<2x512xf32>
    %6 = arith.addf %3, %5 : vector<2x512xf32>
    %cst_5 = arith.constant 0.000000e+00 : f32
    %7 = vector.broadcast %cst_5 : f32 to vector<2x512xf32>
    %8 = arith.cmpf ogt, %6, %7 : vector<2x512xf32>
    %9 = math.exp %6 : vector<2x512xf32>
    %cst_6 = arith.constant 1.000000e+00 : f32
    %10 = vector.broadcast %cst_6 : f32 to vector<2x512xf32>
    %11 = arith.subf %9, %10 : vector<2x512xf32>
    %12 = arith.select %8, %6, %11 : vector<2x512xi1>, vector<2x512xf32>
    %13 = arith.truncf %12 : vector<2x512xf32> to vector<2x512xbf16>
    %c0_7 = arith.constant 0 : index
    %c0_8 = arith.constant 0 : index
    %14 = vector.load %arg2[%c0_7, %c0_8] : memref<2x4xf32, #tpu.memory_space<vmem>>, vector<2x4xf32>
    %15 = arith.truncf %14 : vector<2x4xf32> to vector<2x4xbf16>
    %c0_9 = arith.constant 0 : index
    %c0_10 = arith.constant 0 : index
    %16 = vector.load %arg5[%c0_9, %c0_10] : memref<512x384xbf16, #tpu.memory_space<vmem>>, vector<512x384xbf16>
    %cst_11 = arith.constant dense<0.000000e+00> : vector<2x384xf32>
    %17 = tpu.matmul %13, %16, %cst_11 {dimension_numbers = #tpu.dot_dimension_numbers<[1], [0], [0], [1], [0, 0, 1, 1], [], []>} : vector<2x512xbf16>, vector<512x384xbf16>, vector<2x384xf32> -> vector<2x384xf32>
    %c0_12 = arith.constant 0 : index
    %c0_13 = arith.constant 0 : index
    %18 = vector.load %arg6[%c0_12, %c0_13] : memref<4x384xbf16, #tpu.memory_space<vmem>>, vector<4x384xbf16>
    %cst_14 = arith.constant dense<0.000000e+00> : vector<2x384xf32>
    %19 = tpu.matmul %15, %18, %cst_14 {dimension_numbers = #tpu.dot_dimension_numbers<[1], [0], [0], [1], [0, 0, 1, 1], [], []>} : vector<2x4xbf16>, vector<4x384xbf16>, vector<2x384xf32> -> vector<2x384xf32>
    %20 = arith.addf %17, %19 : vector<2x384xf32>
    %c0_15 = arith.constant 0 : index
    %c0_16 = arith.constant 0 : index
    %21 = vector.load %arg7[%c0_15, %c0_16] : memref<1x384xf32, #tpu.memory_space<vmem>>, vector<1x384xf32>
    %22 = vector.broadcast %21 : vector<1x384xf32> to vector<2x384xf32>
    %23 = arith.addf %20, %22 : vector<2x384xf32>
    %cst_17 = arith.constant 0.000000e+00 : f32
    %24 = vector.broadcast %cst_17 : f32 to vector<2x384xf32>
    %25 = arith.cmpf ogt, %23, %24 : vector<2x384xf32>
    %26 = math.exp %23 : vector<2x384xf32>
    %cst_18 = arith.constant 1.000000e+00 : f32
    %27 = vector.broadcast %cst_18 : f32 to vector<2x384xf32>
    %28 = arith.subf %26, %27 : vector<2x384xf32>
    %29 = arith.select %25, %23, %28 : vector<2x384xi1>, vector<2x384xf32>
    %c0_19 = arith.constant 0 : index
    %c0_20 = arith.constant 0 : index
    %30 = vector.load %arg8[%c0_19, %c0_20] : memref<1x384xf32, #tpu.memory_space<vmem>>, vector<1x384xf32>
    %31 = vector.broadcast %30 : vector<1x384xf32> to vector<2x384xf32>
    %32 = arith.mulf %29, %31 : vector<2x384xf32>
    %cst_21 = arith.constant dense<0.000000e+00> : vector<2xf32>
    %33 = vector.multi_reduction <add>, %32, %cst_21 [1] : vector<2x384xf32> to vector<2xf32>
    %34 = vector.shape_cast %33 : vector<2xf32> to vector<2x1xf32>
    %c0_22 = arith.constant 0 : index
    %c0_23 = arith.constant 0 : index
    %35 = vector.load %arg9[%c0_22, %c0_23] : memref<1x1xf32, #tpu.memory_space<vmem>>, vector<1x1xf32>
    %36 = vector.broadcast %35 : vector<1x1xf32> to vector<2x1xf32>
    %37 = arith.addf %34, %36 : vector<2x1xf32>
    %c0_24 = arith.constant 0 : index
    %c0_25 = arith.constant 0 : index
    %38 = vector.load %arg10[%c0_24, %c0_25] : memref<2x1xf32, #tpu.memory_space<vmem>>, vector<2x1xf32>
    tpu.vector_store %arg10[%c0_24, %c0_25], %37 {strides = array<i32>} : memref<2x1xf32, #tpu.memory_space<vmem>>, vector<2x1xf32>,
    return
  }
  func.func @transform_0(%arg0: i32) -> (i32, i32) {
    %c0_i32 = arith.constant 0 : i32
    %c0_i32_0 = arith.constant 0 : i32
    return %arg0, %c0_i32 : i32, i32
  }
  func.func @transform_1(%arg0: i32) -> (i32, i32) {
    %c0_i32 = arith.constant 0 : i32
    %c0_i32_0 = arith.constant 0 : i32
    return %arg0, %c0_i32 : i32, i32
  }
  func.func @transform_2(%arg0: i32) -> (i32, i32) {
    %c0_i32 = arith.constant 0 : i32
    %c0_i32_0 = arith.constant 0 : i32
    %c0_i32_1 = arith.constant 0 : i32
    return %c0_i32, %c0_i32_0 : i32, i32
  }
  func.func @transform_3(%arg0: i32) -> (i32, i32) {
    %c0_i32 = arith.constant 0 : i32
    %c0_i32_0 = arith.constant 0 : i32
    %c0_i32_1 = arith.constant 0 : i32
    return %c0_i32, %c0_i32_0 : i32, i32
  }
  func.func @transform_4(%arg0: i32) -> (i32, i32) {
    %c0_i32 = arith.constant 0 : i32
    %c0_i32_0 = arith.constant 0 : i32
    %c0_i32_1 = arith.constant 0 : i32
    return %c0_i32, %c0_i32_0 : i32, i32
  }
  func.func @transform_5(%arg0: i32) -> (i32, i32) {
    %c0_i32 = arith.constant 0 : i32
    %c0_i32_0 = arith.constant 0 : i32
    %c0_i32_1 = arith.constant 0 : i32
    return %c0_i32, %c0_i32_0 : i32, i32
  }
  func.func @transform_6(%arg0: i32) -> (i32, i32) {
    %c0_i32 = arith.constant 0 : i32
    %c0_i32_0 = arith.constant 0 : i32
    %c0_i32_1 = arith.constant 0 : i32
    return %c0_i32, %c0_i32_0 : i32, i32
  }
  func.func @transform_7(%arg0: i32) -> (i32, i32) {
    %c0_i32 = arith.constant 0 : i32
    %c0_i32_0 = arith.constant 0 : i32
    %c0_i32_1 = arith.constant 0 : i32
    return %c0_i32, %c0_i32_0 : i32, i32
  }
  func.func @transform_8(%arg0: i32) -> (i32, i32) {
    %c0_i32 = arith.constant 0 : i32
    %c0_i32_0 = arith.constant 0 : i32
    %c0_i32_1 = arith.constant 0 : i32
    return %c0_i32, %c0_i32_0 : i32, i32
  }
  func.func @transform_9(%arg0: i32) -> (i32, i32) {
    %c0_i32 = arith.constant 0 : i32
    %c0_i32_0 = arith.constant 0 : i32
    return %arg0, %c0_i32 : i32, i32
  }
}

</mosaic_0001>

<bundles_post_ra>
// kernel: tpu_custom_call.1
= control target key start
LH: loop header
LB: loop body
LE: loop exit
PB: predicated region body
PF: predicated region fallthrough
CT: control target
= control target key end

     0   :  { %s1833_s0 = inlined_call_operand.hbm [shape: f32[2,16], index: 0, kind: input, shape index: {}]   ;;  %s1834_s1 = inlined_call_operand.hbm [shape: f32[2,4], index: 1, kind: input, shape index: {}]   ;;  %s1835_s2 = inlined_call_operand.hbm [shape: bf16[16,512], index: 2, kind: input, shape index: {}]   ;;  %s1836_s3 = inlined_call_operand.vmem [shape: f32[1,512], index: 3, kind: input, shape index: {}]   ;;  %s1837_s4 = inlined_call_operand.hbm [shape: bf16[512,384], index: 4, kind: input, shape index: {}]   ;;  %s1838_s5 = inlined_call_operand.vmem [shape: bf16[4,384], index: 5, kind: input, shape index: {}]   ;;  %s1839_s6 = inlined_call_operand.vmem [shape: f32[1,384], index: 6, kind: input, shape index: {}]   ;;  %s1840_s7 = inlined_call_operand.vmem [shape: f32[1,384], index: 7, kind: input, shape index: {}]   ;;  %s1841_s8 = inlined_call_operand.<no memory space> [shape: f32[1,1], index: 8, kind: input, shape index: {}]   ;;  %s1842_s9 = inlined_call_operand.vmem [shape: f32[2,1], index: 9, kind: output, shape index: {}]  }
   0x1   :  { %v14_v0 = vstv %s1841_s8 }
   0x2   :  { %15 = vst [vmem:[#allocation2] sm:$0x1] %v14_v0 }
   0x3   :  { %16 = vsyncpa [#allocation4], 0 }
   0x4   :  { %17 = vsyncpa [#allocation6], 0 }
   0x5   :  { %18 = vsyncpa [#allocation9], 0  ;;  %s1660_s11 = smov [#allocation5]   ;;  %s1661_s13 = smov [#allocation3]  }
   0x6   :  { %s35_s12 = sshll.u32 %s1660_s11, 4  ;;  %s25_s14 = sshll.u32 %s1661_s13, 4  ;;  %s36_s12 = int_to_ptr.vmem [resolvable:$true] %s35_s12  ;;  %s26_s14 = int_to_ptr.vmem [resolvable:$true] %s25_s14 }
   0x7   :  { %s1566_s17 = scalar_lea.hbm %s1834_s1, 32 }
   0x8   :  { %p1567_p0 = scmp.ne.s32.totalorder %s1834_s1, %s1566_s17  ;;  %p1570_p1 = scmp.lt.u32.totalorder %s1566_s17, %s1834_s1 }
   0xa   :  { %p1572_p2 = pnand %p1570_p1, %p1567_p0 }
   0xc   :  { %1575 = shalt.err (!%p1572_p2)
}
   0xd   :  { %s1576_s21 = scalar_lea.vmem %s36_s12, 32  ;;  %p1581_p4 = scmp.lt.s32.totalorder %s36_s12, %s36_s12 }
   0xe   :  { %p1577_p3 = scmp.ne.s32.totalorder %s36_s12, %s1576_s21  ;;  %p1582_p5 = scmp.lt.s32.totalorder %s1576_s21, %s1576_s21 }
  0x10   :  { %p1583_p6 = por %p1582_p5, %p1581_p4 }
  0x12   :  { %p1584_p7 = pnand %p1583_p6, %p1577_p3 }
  0x14   :  { %1587 = shalt.err (!%p1584_p7)
}
  0x15   :  { %38 = dma.hbm_to_vmem [thread:$0]  %s1834_s1, 32, %s36_s12, [#allocation6]  }
  0x16   :  { %s1588_s26 = scalar_lea.hbm %s1833_s0, 32 }
  0x17   :  { %p1589_p8 = scmp.ne.s32.totalorder %s1833_s0, %s1588_s26  ;;  %p1592_p9 = scmp.lt.u32.totalorder %s1588_s26, %s1833_s0 }
  0x19   :  { %p1594_p10 = pnand %p1592_p9, %p1589_p8 }
  0x1b   :  { %1597 = shalt.err (!%p1594_p10)
}
  0x1c   :  { %s1598_s10 = scalar_lea.vmem %s26_s14, 32  ;;  %p1603_p12 = scmp.lt.s32.totalorder %s26_s14, %s26_s14 }
  0x1d   :  { %p1599_p11 = scmp.ne.s32.totalorder %s26_s14, %s1598_s10  ;;  %p1604_p13 = scmp.lt.s32.totalorder %s1598_s10, %s1598_s10 }
  0x1f   :  { %p1605_p0 = por %p1604_p13, %p1603_p12 }
  0x21   :  { %p1606_p1 = pnand %p1605_p0, %p1599_p11 }
  0x23   :  { %1609 = shalt.err (!%p1606_p1)
}
  0x24   :  { %28 = dma.hbm_to_vmem [thread:$0]  %s1833_s0, 32, %s26_s14, [#allocation4]  }
  0x25   :  { %s1662_s12 = smov [#allocation7]   ;;  %s1610_s17 = scalar_lea.hbm %s1835_s2, 512 }
  0x26   :  { %s44_s13 = sshll.u32 %s1662_s12, 4  ;;  %p1611_p2 = scmp.ne.s32.totalorder %s1835_s2, %s1610_s17  ;;  %s45_s13 = int_to_ptr.vmem [resolvable:$true] %s44_s13 }
  0x27   :  { %p1614_p3 = scmp.lt.u32.totalorder %s1610_s17, %s1835_s2 }
  0x29   :  { %p1616_p4 = pnand %p1614_p3, %p1611_p2 }
  0x2b   :  { %1619 = shalt.err (!%p1616_p4)
}
  0x2c   :  { %s1620_s21 = scalar_lea.vmem %s45_s13, 512  ;;  %p1625_p6 = scmp.lt.s32.totalorder %s45_s13, %s45_s13 }
  0x2d   :  { %p1621_p5 = scmp.ne.s32.totalorder %s45_s13, %s1620_s21  ;;  %p1626_p7 = scmp.lt.s32.totalorder %s1620_s21, %s1620_s21 }
  0x2f   :  { %p1627_p8 = por %p1626_p7, %p1625_p6 }
  0x31   :  { %p1628_p9 = pnand %p1627_p8, %p1621_p5 }
  0x33   :  { %1631 = shalt.err (!%p1628_p9)
}
  0x34   :  { %s1663_s0 = smov 256   ;;  %s1664_s14 = smov 16  }
  0x35   :  { %50 = dma.hbm_to_vmem [thread:$0]  %s1835_s2, 512, %s45_s13, [#allocation6], %s1663_s0, %s1663_s0, %s1664_s14  }
  0x36   :  { %s1665_s24 = smov [#allocation8]   ;;  %s1632_s28 = scalar_lea.hbm %s1837_s4, 12288 }
  0x37   :  { %s58_s25 = sshll.u32 %s1665_s24, 4  ;;  %p1633_p10 = scmp.ne.s32.totalorder %s1837_s4, %s1632_s28  ;;  %s59_s25 = int_to_ptr.vmem [resolvable:$true] %s58_s25 }
  0x38   :  { %p1636_p11 = scmp.lt.u32.totalorder %s1632_s28, %s1837_s4 }
  0x3a   :  { %p1638_p12 = pnand %p1636_p11, %p1633_p10 }
  0x3c   :  { %1641 = shalt.err (!%p1638_p12)
}
  0x3d   :  { %s1642_s11 = scalar_lea.vmem %s59_s25, 12288  ;;  %p1647_p0 = scmp.lt.s32.totalorder %s59_s25, %s59_s25 }
  0x3e   :  { %p1643_p13 = scmp.ne.s32.totalorder %s59_s25, %s1642_s11  ;;  %p1648_p1 = scmp.lt.s32.totalorder %s1642_s11, %s1642_s11 }
  0x40   :  { %p1649_p2 = por %p1648_p1, %p1647_p0 }
  0x42   :  { %p1650_p3 = pnand %p1649_p2, %p1643_p13 }
  0x44   :  { %1653 = shalt.err (!%p1650_p3)
}
  0x45   :  { %s1666_s2 = smov 192   ;;  %s1667_s12 = smov 12  }
  0x46   :  { %64 = dma.hbm_to_vmem [thread:$0]  %s1837_s4, 12288, %s59_s25, [#allocation9], %s1666_s2, %s1666_s2, %s1667_s12  }
  0x47   :  { %1654 = dma.done.wait [#allocation4], 32  }
  0x48   :  { %1655 = vsyncadd [#allocation4], 4294967264 }
  0x49   :  { %1656 = dma.done.wait [#allocation6], 544  }
  0x4a   :  { %1657 = vsyncadd [#allocation6], 4294966752 }
  0x4b   :  { %1658 = dma.done.wait [#allocation9], 12288  }
  0x4c   :  { %1659 = vsyncadd [#allocation9], 4294955008  ;;  %v94_v1 = vlaneseq  ;;  %v1668_v2 = vmov 0   ;;  %v1669_v3 = vmov 1983009808   ;;  %vm396_vm0 = vcmask 1041408  }
  0x4d   :  { %170 = vmatprep.mubr.bf16.mxu0 %v1668_v2  ;;  %211 = vmatprep.mubr.bf16.mxu1 %v1668_v2  ;;  %v378_v4 = vunpack.c.l.s4 %v1669_v3  ;;  %v1417_v7 = vld [vmem:[#allocation7 + $0x4] ss:$16 sps:$4 sm:$0xff]   ;;  %v1419_v9 = vld [vmem:[#allocation7 + $0xc] ss:$16 sps:$4 sm:$0xff]   ;;  %v1421_v10 = vld [vmem:[#allocation7] ss:$16 sps:$4 sm:$0xff]  }
  0x4e   :  { %v1773_v5 = vshrl.u32 %v94_v1, 7  ;;  %138 = vmatprep.subr.bf16.mxu0 %v1417_v7  ;;  %v1422_v11 = vld [vmem:[#allocation7 + $0x8] ss:$16 sps:$4 sm:$0xff]   ;;  %v86_v12 = vld [vmem:[#allocation3] sm:$0x3]  ;;  %179 = vmatprep.subr.bf16.mxu1 %v1419_v9  ;;  %vm134_vm1 = vcmask 130048  }
  0x4f   :  { %v379_v6 = vunpack.c.0.s8 %v378_v4  ;;  %v87_v13 = vpack.c.bf16 %v86_v12, %v86_v12  ;;  %v374_v14 = vld [vmem:[%s1838_s5] sm:$0x3f]  ;;  %139 = vmatpush1.bf16.msra.mxu0 %v1421_v10  ;;  %180 = vmatpush1.bf16.msra.mxu1 %v1422_v11  ;;  %v1670_v17 = vmov 0.0   ;;  %v1426_v21 = vld [vmem:[#allocation8 + $0x4] ss:$12 sps:$4 sm:$0xff]   ;;  %vm1671_vm2 = vmmov 0  }
  0x50   :  { %v376_v16 = vcombine.high %v374_v14, %v374_v14  ;;  %1399 = vmatprep.subr.bf16.mxu1 %v1670_v17  ;;  %v1429_v22 = vld [vmem:[#allocation8 + $0x184] ss:$12 sps:$4 sm:$0xff]   ;;  %v244_v24 = vld [vmem:[#allocation5] sm:$0x3]  ;;  %v1424_v26 = vld [vmem:[#allocation8] ss:$12 sps:$4 sm:$0xff]  }
  0x51   :  { %v382_v8 = vsub.s32 %v379_v6, %v1773_v5  ;;  %v245_v25 = vpack.c.bf16 %v244_v24, %v244_v24  ;;  %vm392_vm3 = vcmask 31744   ;;  %v1427_v27 = vld [vmem:[#allocation8 + $0x180] ss:$12 sps:$4 sm:$0xff]   ;;  %v1432_v28 = vld [vmem:[#allocation8 + $0x1c] ss:$12 sps:$4 sm:$0xff]   ;;  %vm1231_vm11 = vcmask 1024  }
  0x52   :  { %1244 = vmatmul.mubr.msk.bf16.vlgmr.msra.gmra.mrb[0].mxu0 %vm134_vm1, %v87_v13  ;;  %1245 = vmatmul.mubr.msk.bf16.vlgmr.msra.gmra.mrb[0].mxu1 %vm134_vm1, %v87_v13  ;;  %v1435_v29 = vld [vmem:[#allocation8 + $0x19c] ss:$12 sps:$4 sm:$0xff]   ;;  %v1430_v30 = vld [vmem:[#allocation8 + $0x18] ss:$12 sps:$4 sm:$0xff]   ;;  %v1438_v32 = vld [vmem:[#allocation8 + $0x34] ss:$12 sps:$4 sm:$0xff]  }
  0x53   :  { %v383_v15 = vrot.slane %v374_v14, %v382_v8  ;;  %v390_v20 = vrot.slane %v376_v16, %v382_v8  ;;  %438 = vmatprep.mubr.bf16.mxu0 %v1668_v2  ;;  %1401 = vmatprep.mubr.msk.bf16.mxu1 %vm1671_vm2, %v1670_v17  ;;  %v1433_v31 = vld [vmem:[#allocation8 + $0x198] ss:$12 sps:$4 sm:$0xff]   ;;  %v1441_v33 = vld [vmem:[#allocation8 + $0x1b4] ss:$12 sps:$4 sm:$0xff]   ;;  %v1436_v34 = vld [vmem:[#allocation8 + $0x30] ss:$12 sps:$4 sm:$0xff]  }
  0x54   :  { %v1439_v35 = vld [vmem:[#allocation8 + $0x1b0] ss:$12 sps:$4 sm:$0xff]   ;;  %v1444_v36 = vld [vmem:[#allocation8 + $0x4c] ss:$12 sps:$4 sm:$0xff]   ;;  %v1442_v38 = vld [vmem:[#allocation8 + $0x48] ss:$12 sps:$4 sm:$0xff]  }
  0x55   :  { %v391_v18 = vcombine.high %v383_v15, %v383_v15  ;;  %v398_v19 = vsel %vm396_vm0, %v383_v15, 0  ;;  %v404_v23 = vsel %vm396_vm0, %v390_v20, 0  ;;  %v1447_v37 = vld [vmem:[#allocation8 + $0x1cc] ss:$12 sps:$4 sm:$0xff]   ;;  %v1445_v39 = vld [vmem:[#allocation8 + $0x1c8] ss:$12 sps:$4 sm:$0xff]  }
  0x56   :  { %1400 = vmatpush3.bf16.msra.mxu1 %v404_v23  ;;  %v1450_v40 = vld [vmem:[#allocation8 + $0x64] ss:$12 sps:$4 sm:$0xff]   ;;  %v1448_v42 = vld [vmem:[#allocation8 + $0x60] ss:$12 sps:$4 sm:$0xff]   ;;  %v1456_v44 = vld [vmem:[#allocation8 + $0x7c] ss:$12 sps:$4 sm:$0xff]  }
  0x57   :  { %1250 = vmatprep.subr.msk.bf16.mxu0 %vm396_vm0, %v391_v18  ;;  %1040 = vmatprep.subr.bf16.mxu1 %v1429_v22  ;;  %v1453_v41 = vld [vmem:[#allocation8 + $0x1e4] ss:$12 sps:$4 sm:$0xff]   ;;  %v1451_v43 = vld [vmem:[#allocation8 + $0x1e0] ss:$12 sps:$4 sm:$0xff]   ;;  %v1459_v45 = vld [vmem:[#allocation8 + $0x1fc] ss:$12 sps:$4 sm:$0xff]  }
  0x58   :  { %407 = vmatpush1.bf16.msra.mxu0 %v398_v19  ;;  %v1454_v46 = vld [vmem:[#allocation8 + $0x78] ss:$12 sps:$4 sm:$0xff]   ;;  %v1462_v48 = vld [vmem:[#allocation8 + $0x94] ss:$12 sps:$4 sm:$0xff]   ;;  %v1460_v50 = vld [vmem:[#allocation8 + $0x90] ss:$12 sps:$4 sm:$0xff]  }
  0x59   :  { %999 = vmatprep.subr.bf16.mxu0 %v1426_v21  ;;  %v1457_v47 = vld [vmem:[#allocation8 + $0x1f8] ss:$12 sps:$4 sm:$0xff]   ;;  %v1465_v49 = vld [vmem:[#allocation8 + $0x214] ss:$12 sps:$4 sm:$0xff]   ;;  %v1463_v51 = vld [vmem:[#allocation8 + $0x210] ss:$12 sps:$4 sm:$0xff]  }
  0x5a   :  { %1402 = vmatmul.mubr.msk.bf16.vlgmr.msra.gmra.mrb[4].mxu1 %vm392_vm3, %v245_v25  ;;  %v1468_v52 = vld [vmem:[#allocation8 + $0xac] ss:$12 sps:$4 sm:$0xff]   ;;  %v1466_v54 = vld [vmem:[#allocation8 + $0xa8] ss:$12 sps:$4 sm:$0xff]   ;;  %v1474_v56 = vld [vmem:[#allocation8 + $0xc4] ss:$12 sps:$4 sm:$0xff]  }
  0x5b   :  { %1251 = vmatmul.mubr.msk.bf16.vlgmr.msra.gmra.mrb[4].mxu0 %vm392_vm3, %v245_v25  ;;  %1041 = vmatpush1.bf16.msra.mxu1 %v1427_v27  ;;  %v1471_v53 = vld [vmem:[#allocation8 + $0x22c] ss:$12 sps:$4 sm:$0xff]   ;;  %v1469_v55 = vld [vmem:[#allocation8 + $0x228] ss:$12 sps:$4 sm:$0xff]   ;;  %v1477_v57 = vld [vmem:[#allocation8 + $0x244] ss:$12 sps:$4 sm:$0xff]  }
  0x5c   :  { %1000 = vmatpush1.bf16.msra.mxu0 %v1424_v26  ;;  %1042 = vmatprep.subr.bf16.mxu1 %v1435_v29  ;;  %v1472_v58 = vld [vmem:[#allocation8 + $0xc0] ss:$12 sps:$4 sm:$0xff]   ;;  %v1480_v60 = vld [vmem:[#allocation8 + $0xdc] ss:$12 sps:$4 sm:$0xff]   ;;  %v1478_v62 = vld [vmem:[#allocation8 + $0xd8] ss:$12 sps:$4 sm:$0xff]  }
  0x5d   :  { %1001 = vmatprep.subr.bf16.mxu0 %v1432_v28  ;;  %v1475_v59 = vld [vmem:[#allocation8 + $0x240] ss:$12 sps:$4 sm:$0xff]   ;;  %v1483_v61 = vld [vmem:[#allocation8 + $0x25c] ss:$12 sps:$4 sm:$0xff]   ;;  %v1481_v63 = vld [vmem:[#allocation8 + $0x258] ss:$12 sps:$4 sm:$0xff]  }
  0x5e   :  { %v1486_v0 = vld [vmem:[#allocation8 + $0xf4] ss:$12 sps:$4 sm:$0xff]   ;;  %v1484_v2 = vld [vmem:[#allocation8 + $0xf0] ss:$12 sps:$4 sm:$0xff]   ;;  %v1492_v4 = vld [vmem:[#allocation8 + $0x10c] ss:$12 sps:$4 sm:$0xff]  }
  0x5f   :  { %1043 = vmatpush1.bf16.msra.mxu1 %v1433_v31  ;;  %v1489_v1 = vld [vmem:[#allocation8 + $0x274] ss:$12 sps:$4 sm:$0xff]   ;;  %v1487_v3 = vld [vmem:[#allocation8 + $0x270] ss:$12 sps:$4 sm:$0xff]   ;;  %v1495_v6 = vld [vmem:[#allocation8 + $0x28c] ss:$12 sps:$4 sm:$0xff]  }
  0x60   :  { %1002 = vmatpush1.bf16.msra.mxu0 %v1430_v30  ;;  %1044 = vmatprep.subr.bf16.mxu1 %v1441_v33  ;;  %v1490_v7 = vld [vmem:[#allocation8 + $0x108] ss:$12 sps:$4 sm:$0xff]   ;;  %v1498_v9 = vld [vmem:[#allocation8 + $0x124] ss:$12 sps:$4 sm:$0xff]   ;;  %v1496_v11 = vld [vmem:[#allocation8 + $0x120] ss:$12 sps:$4 sm:$0xff]  }
  0x61   :  { %1003 = vmatprep.subr.bf16.mxu0 %v1438_v32  ;;  %v1493_v8 = vld [vmem:[#allocation8 + $0x288] ss:$12 sps:$4 sm:$0xff]   ;;  %v1501_v10 = vld [vmem:[#allocation8 + $0x2a4] ss:$12 sps:$4 sm:$0xff]   ;;  %v1499_v12 = vld [vmem:[#allocation8 + $0x2a0] ss:$12 sps:$4 sm:$0xff]  }
  0x62   :  { %v1504_v13 = vld [vmem:[#allocation8 + $0x13c] ss:$12 sps:$4 sm:$0xff]   ;;  %v1502_v15 = vld [vmem:[#allocation8 + $0x138] ss:$12 sps:$4 sm:$0xff]   ;;  %v1510_v17 = vld [vmem:[#allocation8 + $0x154] ss:$12 sps:$4 sm:$0xff]  }
  0x63   :  { %1045 = vmatpush1.bf16.msra.mxu1 %v1439_v35  ;;  %v1507_v14 = vld [vmem:[#allocation8 + $0x2bc] ss:$12 sps:$4 sm:$0xff]   ;;  %v1505_v16 = vld [vmem:[#allocation8 + $0x2b8] ss:$12 sps:$4 sm:$0xff]   ;;  %v1513_v18 = vld [vmem:[#allocation8 + $0x2d4] ss:$12 sps:$4 sm:$0xff]  }
  0x64   :  { %1004 = vmatpush1.bf16.msra.mxu0 %v1436_v34  ;;  %1046 = vmatprep.subr.bf16.mxu1 %v1447_v37  ;;  %v1508_v19 = vld [vmem:[#allocation8 + $0x150] ss:$12 sps:$4 sm:$0xff]   ;;  %v1516_v21 = vld [vmem:[#allocation8 + $0x16c] ss:$12 sps:$4 sm:$0xff]   ;;  %v1514_v23 = vld [vmem:[#allocation8 + $0x168] ss:$12 sps:$4 sm:$0xff]  }
  0x65   :  { %1005 = vmatprep.subr.bf16.mxu0 %v1444_v36  ;;  %v1511_v20 = vld [vmem:[#allocation8 + $0x2d0] ss:$12 sps:$4 sm:$0xff]   ;;  %v1519_v22 = vld [vmem:[#allocation8 + $0x2ec] ss:$12 sps:$4 sm:$0xff]   ;;  %v1517_v24 = vld [vmem:[#allocation8 + $0x2e8] ss:$12 sps:$4 sm:$0xff]  }
  0x66   :  { %v1520_v25 = vld [vmem:[#allocation8 + $0xc8] ss:$12 sps:$4 sm:$0xff]   ;;  %v1783_v27 = vsub.s32 0, %v1773_v5  ;;  %v1786_v28 = vsub.s32 2, %v1773_v5  ;;  %v92_v29 = vld [vmem:[%s1836_s3] sm:$0xf] }
  0x67   :  { %1047 = vmatpush1.bf16.msra.mxu1 %v1445_v39  ;;  %v1521_v26 = vld [vmem:[#allocation8 + $0x248] ss:$12 sps:$4 sm:$0xff]   ;;  %v1792_v30 = vsub.s32 1, %v1773_v5  ;;  %v108_v31 = vsub.s32 3, %v1773_v5 }
  0x68   :  { %1006 = vmatpush1.bf16.msra.mxu0 %v1442_v38  ;;  %1048 = vmatprep.subr.bf16.mxu1 %v1453_v41  ;;  %v97_v32 = vrot.slane %v92_v29, %v1783_v27  ;;  %v105_v33 = vrot.slane %v92_v29, %v1786_v28 }
  0x69   :  { %1007 = vmatprep.subr.bf16.mxu0 %v1450_v40  ;;  %v101_v34 = vrot.slane %v92_v29, %v1792_v30  ;;  %v109_v35 = vrot.slane %v92_v29, %v108_v31  ;;  %v1537_v29 = vld [vmem:[#allocation8 + $0x2a8] ss:$12 sps:$4 sm:$0xff]  }
  0x6a   :  { %v1538_v31 = vld [vmem:[#allocation8 + $0x68] ss:$12 sps:$4 sm:$0xff]  }
  0x6b   :  { %1049 = vmatpush1.bf16.msra.mxu1 %v1451_v43 }
  0x6c   :  { %1008 = vmatpush1.bf16.msra.mxu0 %v1448_v42  ;;  %1050 = vmatprep.subr.bf16.mxu1 %v1459_v45 }
  0x6d   :  { %1009 = vmatprep.subr.bf16.mxu0 %v1456_v44 }
  0x6f   :  { %1051 = vmatpush1.bf16.msra.mxu1 %v1457_v47 }
  0x70   :  { %1010 = vmatpush1.bf16.msra.mxu0 %v1454_v46  ;;  %1052 = vmatprep.subr.bf16.mxu1 %v1465_v49 }
  0x71   :  { %1011 = vmatprep.subr.bf16.mxu0 %v1462_v48 }
  0x73   :  { %1053 = vmatpush1.bf16.msra.mxu1 %v1463_v51 }
  0x74   :  { %1012 = vmatpush1.bf16.msra.mxu0 %v1460_v50  ;;  %1054 = vmatprep.subr.bf16.mxu1 %v1471_v53 }
  0x75   :  { %1013 = vmatprep.subr.bf16.mxu0 %v1468_v52 }
  0x77   :  { %1055 = vmatpush1.bf16.msra.mxu1 %v1469_v55 }
  0x78   :  { %1014 = vmatpush1.bf16.msra.mxu0 %v1466_v54  ;;  %1056 = vmatprep.subr.bf16.mxu1 %v1477_v57 }
  0x79   :  { %1015 = vmatprep.subr.bf16.mxu0 %v1474_v56 }
  0x7b   :  { %1057 = vmatpush1.bf16.msra.mxu1 %v1475_v59 }
  0x7c   :  { %1016 = vmatpush1.bf16.msra.mxu0 %v1472_v58  ;;  %1058 = vmatprep.subr.bf16.mxu1 %v1483_v61 }
  0x7d   :  { %1017 = vmatprep.subr.bf16.mxu0 %v1480_v60 }
  0x7f   :  { %1059 = vmatpush1.bf16.msra.mxu1 %v1481_v63 }
  0x80   :  { %1018 = vmatpush1.bf16.msra.mxu0 %v1478_v62  ;;  %1060 = vmatprep.subr.bf16.mxu1 %v1489_v1 }
  0x81   :  { %1019 = vmatprep.subr.bf16.mxu0 %v1486_v0 }
  0x83   :  { %1061 = vmatpush1.bf16.msra.mxu1 %v1487_v3 }
  0x84   :  { %1020 = vmatpush1.bf16.msra.mxu0 %v1484_v2  ;;  %1062 = vmatprep.subr.bf16.mxu1 %v1495_v6 }
  0x85   :  { %1021 = vmatprep.subr.bf16.mxu0 %v1492_v4 }
  0x87   :  { %1063 = vmatpush1.bf16.msra.mxu1 %v1493_v8 }
  0x88   :  { %1022 = vmatpush1.bf16.msra.mxu0 %v1490_v7  ;;  %1064 = vmatprep.subr.bf16.mxu1 %v1501_v10 }
  0x89   :  { %1023 = vmatprep.subr.bf16.mxu0 %v1498_v9  ;;  %v1522_v9 = vld [vmem:[#allocation8 + $0x8] ss:$12 sps:$4 sm:$0xff]  }
  0x8b   :  { %1065 = vmatpush1.bf16.msra.mxu1 %v1499_v12  ;;  %v1523_v12 = vld [vmem:[#allocation8 + $0x188] ss:$12 sps:$4 sm:$0xff]  }
  0x8c   :  { %1024 = vmatpush1.bf16.msra.mxu0 %v1496_v11  ;;  %1066 = vmatprep.subr.bf16.mxu1 %v1507_v14  ;;  %v1524_v14 = vld [vmem:[#allocation8 + $0xe0] ss:$12 sps:$4 sm:$0xff]  }
  0x8d   :  { %1025 = vmatprep.subr.bf16.mxu0 %v1504_v13 }
  0x8f   :  { %1067 = vmatpush1.bf16.msra.mxu1 %v1505_v16  ;;  %v1526_v16 = vld [vmem:[#allocation8 + $0x20] ss:$12 sps:$4 sm:$0xff]  }
  0x90   :  { %1026 = vmatpush1.bf16.msra.mxu0 %v1502_v15  ;;  %1068 = vmatprep.subr.bf16.mxu1 %v1513_v18  ;;  %v1525_v15 = vld [vmem:[#allocation8 + $0x260] ss:$12 sps:$4 sm:$0xff]   ;;  %v1528_v18 = vld [vmem:[#allocation8 + $0xf8] ss:$12 sps:$4 sm:$0xff]  }
  0x91   :  { %1027 = vmatprep.subr.bf16.mxu0 %v1510_v17  ;;  %v1527_v17 = vld [vmem:[#allocation8 + $0x1a0] ss:$12 sps:$4 sm:$0xff]  }
  0x93   :  { %1069 = vmatpush1.bf16.msra.mxu1 %v1511_v20  ;;  %v1530_v20 = vld [vmem:[#allocation8 + $0x38] ss:$12 sps:$4 sm:$0xff]  }
  0x94   :  { %1028 = vmatpush1.bf16.msra.mxu0 %v1508_v19  ;;  %1070 = vmatprep.subr.bf16.mxu1 %v1519_v22  ;;  %v1529_v19 = vld [vmem:[#allocation8 + $0x278] ss:$12 sps:$4 sm:$0xff]   ;;  %v1532_v22 = vld [vmem:[#allocation8 + $0x110] ss:$12 sps:$4 sm:$0xff]  }
  0x95   :  { %1029 = vmatprep.subr.bf16.mxu0 %v1516_v21  ;;  %v1531_v21 = vld [vmem:[#allocation8 + $0x1b8] ss:$12 sps:$4 sm:$0xff]  }
  0x97   :  { %1071 = vmatpush1.bf16.msra.mxu1 %v1517_v24  ;;  %v1534_v24 = vld [vmem:[#allocation8 + $0x50] ss:$12 sps:$4 sm:$0xff]  }
  0x98   :  { %1030 = vmatpush1.bf16.msra.mxu0 %v1514_v23  ;;  %1377 = vmatprep.subr.bf16.mxu1 %v1521_v26  ;;  %v1533_v23 = vld [vmem:[#allocation8 + $0x290] ss:$12 sps:$4 sm:$0xff]   ;;  %v1536_v26 = vld [vmem:[#allocation8 + $0x128] ss:$12 sps:$4 sm:$0xff]  }
  0x99   :  { %1355 = vmatprep.subr.bf16.mxu0 %v1520_v25  ;;  %v1535_v25 = vld [vmem:[#allocation8 + $0x1d0] ss:$12 sps:$4 sm:$0xff]  }
 0x125   :  { %v172_v36 = vpop.f32.mrb[0].mxu0  ;;  %v213_v37 = vpop.f32.mrb[0].mxu1 }
 0x126   :  { %v173_v38 = vadd.f32 %v172_v36, %v97_v32  ;;  %v214_v39 = vadd.f32 %v213_v37, %v105_v33  ;;  %v174_v40 = vpop.f32.mrb[1].mxu0  ;;  %v215_v41 = vpop.f32.mrb[1].mxu1  ;;  %v1539_v32 = vld [vmem:[#allocation8 + $0x1e8] ss:$12 sps:$4 sm:$0xff]   ;;  %v1540_v33 = vld [vmem:[#allocation8 + $0x140] ss:$12 sps:$4 sm:$0xff]  }
 0x127   :  { %v175_v42 = vadd.f32 %v174_v40, %v101_v34  ;;  %v216_v43 = vadd.f32 %v215_v41, %v109_v35  ;;  %v176_v44 = vpop.f32.mrb[2].mxu0  ;;  %v217_v45 = vpop.f32.mrb[2].mxu1  ;;  %v1541_v34 = vld [vmem:[#allocation8 + $0x2c0] ss:$12 sps:$4 sm:$0xff]   ;;  %v1544_v37 = vld [vmem:[#allocation8 + $0x158] ss:$12 sps:$4 sm:$0xff]  }
 0x128   :  { %v224_v46 = vmul.f32 1.442695, %v173_v38  ;;  %v228_v47 = vmul.f32 1.442695, %v214_v39  ;;  %v177_v49 = vpop.f32.mrb[3].mxu0  ;;  %v218_v50 = vpop.f32.mrb[3].mxu1 }
 0x129   :  { %v226_v5 = vmul.f32 1.442695, %v175_v42  ;;  %v230_v48 = vmul.f32 1.442695, %v216_v43  ;;  %vm220_vm4 = vcmp.gt.f32.partialorder %v173_v38, 0.0  ;;  %vm222_vm5 = vcmp.gt.f32.partialorder %v214_v39, 0.0 }
 0x12a   :  { %1552 = vpow2.f32 %v224_v46  ;;  %vm221_vm6 = vcmp.gt.f32.partialorder %v175_v42, 0.0  ;;  %vm223_vm7 = vcmp.gt.f32.partialorder %v216_v43, 0.0  ;;  %v1542_v35 = vld [vmem:[#allocation8 + $0x80] ss:$12 sps:$4 sm:$0xff]   ;;  %v1547_v40 = vld [vmem:[#allocation8 + $0x218] ss:$12 sps:$4 sm:$0xff]  }
 0x12b   :  { %1554 = vpow2.f32 %v228_v47  ;;  %v1543_v36 = vld [vmem:[#allocation8 + $0x200] ss:$12 sps:$4 sm:$0xff]   ;;  %v1548_v41 = vld [vmem:[#allocation8 + $0x170] ss:$12 sps:$4 sm:$0xff]  }
 0x12c   :  { %1556 = vpow2.f32 %v226_v5  ;;  %v1551_v44 = vld [vmem:[#allocation8 + $0x230] ss:$12 sps:$4 sm:$0xff]  }
 0x12d   :  { %1558 = vpow2.f32 %v230_v48  ;;  %v1800_v52 = vpop.f32.mrb[4].mxu1  ;;  %v1161_v45 = vld [vmem:[%s1839_s6] sm:$0x7] }
 0x12e   :  { %v1798_v51 = vpop.f32.mrb[4].mxu0  ;;  %v1403_v54 = vpop.f32.mrb[5].mxu1  ;;  %v1166_v48 = vrot.slane %v1161_v45, %v1783_v27 }
 0x12f   :  { %v1802_v53 = vpop.f32.mrb[5].mxu0  ;;  %v484_v56 = vpop.f32.mrb[6].mxu1 }
 0x130   :  { %v444_v55 = vpop.f32.mrb[6].mxu0  ;;  %v1404_v58 = vpop.f32.mrb[7].mxu1 }
 0x131   :  { %v445_v57 = vpop.f32.mrb[7].mxu0  ;;  %v1170_v55 = vrot.slane %v1161_v45, %v1792_v30 }
 0x134   :  { %v1553_v59 = vpop.eup %1552 }
 0x135   :  { %v1555_v60 = vpop.eup %1554  ;;  %v1246_v61 = vadd.f32 -1.0, %v1553_v59 }
 0x136   :  { %v1557_v62 = vpop.eup %1556  ;;  %v1248_v63 = vadd.f32 -1.0, %v1555_v60 }
 0x137   :  { %v1559_v0 = vpop.eup %1558  ;;  %v1247_v1 = vadd.f32 -1.0, %v1557_v62  ;;  %v236_v2 = vsel %vm220_vm4, %v173_v38, %v1246_v61  ;;  %v1545_v38 = vld [vmem:[#allocation8 + $0x2d8] ss:$12 sps:$4 sm:$0xff]  }
 0x138   :  { %v1249_v3 = vadd.f32 -1.0, %v1559_v0  ;;  %v238_v4 = vsel %vm222_vm5, %v214_v39, %v1248_v63  ;;  %v1804_v10 = vpack.c.bf16 %v236_v2, %v236_v2  ;;  %v1546_v39 = vld [vmem:[#allocation8 + $0x98] ss:$12 sps:$4 sm:$0xff]  }
 0x139   :  { %v237_v6 = vsel %vm221_vm6, %v175_v42, %v1247_v1  ;;  %v1806_v13 = vpack.c.bf16 %v238_v4, %v238_v4  ;;  %v1549_v42 = vld [vmem:[#allocation8 + $0x2f0] ss:$12 sps:$4 sm:$0xff]  }
 0x13a   :  { %v241_v7 = vpack.c.bf16 %v237_v6, %v237_v6  ;;  %v239_v8 = vsel %vm223_vm7, %v216_v43, %v1249_v3  ;;  %v1550_v43 = vld [vmem:[#allocation8 + $0xb0] ss:$12 sps:$4 sm:$0xff]  }
 0x13b   :  { %v243_v11 = vpack.c.bf16 %v239_v8, %v239_v8 }
 0x13c   :  { %1031 = vmatprep.mubr.bf16.mxu0 %v241_v7 }
 0x13d   :  { %1072 = vmatprep.mubr.bf16.mxu1 %v243_v11  ;;  %1032 = vmatmul.mubr.bf16.vlgmr.msra.gmra.mrb[8].mxu0 %v1804_v10 }
 0x13e   :  { %1073 = vmatmul.mubr.bf16.vlgmr.msra.gmra.mrb[8].mxu1 %v1806_v13  ;;  %1356 = vmatpush3.bf16.msra.mxu0 %v1522_v9 }
 0x13f   :  { %1378 = vmatpush3.bf16.msra.mxu1 %v1523_v12  ;;  %1113 = vmatprep.mubr.bf16.mxu0 %v241_v7 }
 0x140   :  { %1153 = vmatprep.mubr.bf16.mxu1 %v243_v11  ;;  %1357 = vmatprep.subr.bf16.mxu0 %v1524_v14 }
 0x141   :  { %1379 = vmatprep.subr.bf16.mxu1 %v1525_v15 }
 0x142   :  { %1358 = vmatpush3.bf16.msra.mxu0 %v1526_v16 }
 0x143   :  { %1380 = vmatpush3.bf16.msra.mxu1 %v1527_v17  ;;  %1359 = vmatprep.subr.bf16.mxu0 %v1528_v18 }
 0x144   :  { %1381 = vmatprep.subr.bf16.mxu1 %v1529_v19 }
 0x146   :  { %1360 = vmatpush3.bf16.msra.mxu0 %v1530_v20 }
 0x147   :  { %1382 = vmatpush3.bf16.msra.mxu1 %v1531_v21  ;;  %1361 = vmatprep.subr.bf16.mxu0 %v1532_v22 }
 0x148   :  { %1383 = vmatprep.subr.bf16.mxu1 %v1533_v23  ;;  %v1174_v23 = vrot.slane %v1161_v45, %v1786_v28 }
 0x14a   :  { %1362 = vmatpush3.bf16.msra.mxu0 %v1534_v24 }
 0x14b   :  { %1384 = vmatpush3.bf16.msra.mxu1 %v1535_v25  ;;  %1363 = vmatprep.subr.bf16.mxu0 %v1536_v26 }
 0x14c   :  { %1385 = vmatprep.subr.bf16.mxu1 %v1537_v29 }
 0x14e   :  { %1364 = vmatpush3.bf16.msra.mxu0 %v1538_v31 }
 0x14f   :  { %1386 = vmatpush3.bf16.msra.mxu1 %v1539_v32  ;;  %1365 = vmatprep.subr.bf16.mxu0 %v1540_v33 }
 0x150   :  { %1387 = vmatprep.subr.bf16.mxu1 %v1541_v34 }
 0x152   :  { %1366 = vmatpush3.bf16.msra.mxu0 %v1542_v35 }
 0x153   :  { %1388 = vmatpush3.bf16.msra.mxu1 %v1543_v36  ;;  %1367 = vmatprep.subr.bf16.mxu0 %v1544_v37 }
 0x154   :  { %1389 = vmatprep.subr.bf16.mxu1 %v1545_v38  ;;  %v1352_v38 = vld [vmem:[#allocation2] ss:$0 sm:$0xff] }
 0x156   :  { %1368 = vmatpush3.bf16.msra.mxu0 %v1546_v39 }
 0x157   :  { %1390 = vmatpush3.bf16.msra.mxu1 %v1547_v40  ;;  %1369 = vmatprep.subr.bf16.mxu0 %v1548_v41 }
 0x158   :  { %1391 = vmatprep.subr.bf16.mxu1 %v1549_v42 }
 0x15a   :  { %1370 = vmatpush3.bf16.msra.mxu0 %v1550_v43 }
 0x15b   :  { %1392 = vmatpush3.bf16.msra.mxu1 %v1551_v44 }
 0x15d   :  { %1114 = vmatmul.mubr.bf16.vlgmr.msra.gmra.mrb[12].mxu0 %v1804_v10 }
 0x15e   :  { %1154 = vmatmul.mubr.bf16.vlgmr.msra.gmra.mrb[12].mxu1 %v1806_v13 }
 0x210   :  { %v1033_v46 = vpop.f32.mrb[8].mxu0 }
 0x211   :  { %v1034_v47 = vadd.f32 %v1033_v46, %v1798_v51  ;;  %v1074_v5 = vpop.f32.mrb[8].mxu1  ;;  %v1035_v49 = vpop.f32.mrb[9].mxu0  ;;  %v1196_v51 = vld [vmem:[%s1840_s7] sm:$0x7] }
 0x212   :  { %v1036_v50 = vadd.f32 %v1035_v49, %v1802_v53  ;;  %v1076_v54 = vpop.f32.mrb[9].mxu1  ;;  %v1037_v56 = vpop.f32.mrb[10].mxu0  ;;  %v1201_v2 = vrot.slane %v1196_v51, %v1783_v27  ;;  %v1205_v6 = vrot.slane %v1196_v51, %v1792_v30  ;;  %v1209_v32 = vrot.slane %v1196_v51, %v1786_v28 }
 0x213   :  { %v1075_v57 = vadd.f32 %v1074_v5, %v1034_v47  ;;  %v1078_v58 = vpop.f32.mrb[10].mxu1  ;;  %v1038_v59 = vpop.f32.mrb[11].mxu0 }
 0x214   :  { %v1077_v60 = vadd.f32 %v1076_v54, %v1036_v50  ;;  %v1079_v61 = vpop.f32.mrb[11].mxu1 }
 0x215   :  { %v1178_v62 = vadd.f32 %v1166_v48, %v1075_v57 }
 0x216   :  { %v1179_v63 = vadd.f32 %v1170_v55, %v1077_v60 }
 0x217   :  { %v1184_v0 = vmul.f32 1.442695, %v1178_v62  ;;  %vm1181_vm8 = vcmp.gt.f32.partialorder %v1178_v62, 0.0 }
 0x218   :  { %v1186_v1 = vmul.f32 1.442695, %v1179_v63  ;;  %vm1182_vm9 = vcmp.gt.f32.partialorder %v1179_v63, 0.0 }
 0x219   :  { %1560 = vpow2.f32 %v1184_v0 }
 0x21a   :  { %1562 = vpow2.f32 %v1186_v1 }
 0x223   :  { %v1561_v53 = vpop.eup %1560 }
 0x224   :  { %v1563_v3 = vpop.eup %1562  ;;  %v1349_v4 = vadd.f32 -1.0, %v1561_v53 }
 0x225   :  { %v1350_v7 = vadd.f32 -1.0, %v1563_v3 }
 0x226   :  { %v1193_v8 = vsel %vm1181_vm8, %v1178_v62, %v1349_v4 }
 0x227   :  { %v1194_v9 = vsel %vm1182_vm9, %v1179_v63, %v1350_v7  ;;  %v1213_v10 = vmul.f32 %v1201_v2, %v1193_v8 }
 0x228   :  { %v1214_v11 = vmul.f32 %v1205_v6, %v1194_v9 }
 0x229   :  { %v1216_v12 = vsel %vm396_vm0, %v1213_v10, 0.0 }
 0x22a   :  { %v1217_v13 = vsel %vm396_vm0, %v1214_v11, 0.0 }
 0x22b   :  { %v1218_v14 = vadd.f32 %v1217_v13, %v1216_v12 }
 0x230   :  { %v1371_v15 = vpop.f32.mrb[12].mxu0 }
 0x231   :  { %v1393_v16 = vpop.f32.mrb[12].mxu1  ;;  %v1372_v17 = vpop.f32.mrb[13].mxu0 }
 0x232   :  { %v1373_v27 = vadd.f32 %v1372_v17, %v1371_v15  ;;  %v1394_v18 = vpop.f32.mrb[13].mxu1  ;;  %v1374_v19 = vpop.f32.mrb[14].mxu0 }
 0x233   :  { %v1395_v20 = vadd.f32 %v1394_v18, %v1393_v16  ;;  %v1396_v30 = vpop.f32.mrb[14].mxu1  ;;  %v1375_v21 = vpop.f32.mrb[15].mxu0 }
 0x234   :  { %v1116_v22 = vadd.f32 %v1373_v27, %v1800_v52  ;;  %v1397_v24 = vpop.f32.mrb[15].mxu1 }
 0x236   :  { %v1156_v25 = vadd.f32 %v1395_v20, %v1116_v22 }
 0x238   :  { %v1180_v26 = vadd.f32 %v1174_v23, %v1156_v25 }
 0x23a   :  { %v1188_v29 = vmul.f32 1.442695, %v1180_v26  ;;  %vm1183_vm10 = vcmp.gt.f32.partialorder %v1180_v26, 0.0 }
 0x23c   :  { %1564 = vpow2.f32 %v1188_v29 }
 0x246   :  { %v1565_v31 = vpop.eup %1564 }
 0x247   :  { %v1351_v33 = vadd.f32 -1.0, %v1565_v31 }
 0x249   :  { %v1195_v34 = vsel %vm1183_vm10, %v1180_v26, %v1351_v33 }
 0x24a   :  { %v1215_v35 = vmul.f32 %v1209_v32, %v1195_v34 }
 0x24c   :  { %v1219_v36 = vsel %vm396_vm0, %v1215_v35, 0.0 }
 0x24d   :  { %v1220_v37 = vadd.f32 %v1219_v36, %v1218_v14 }
 0x24f   :  { %1221 = vadd.xlane.f32.xlu0 %v1220_v37 }
 0x2dc   :  { %v1222_v52 = vpop.xlane.xlu0 %1221 }
 0x2dd   :  { %v1230_v39 = vadd.f32 %v1352_v38, %v1222_v52 }
 0x2df   :  { %1232 = vst.msk [vmem:[%s1842_s9] sm:$0x3] %vm1231_vm11, %v1230_v39 }
 0x2e0   :  { %1237 = vsyncpa [#allocation4], 1 }
 0x2e1   :  { %1238 = vsyncpa [#allocation6], 1 }
 0x2e2   :  { %1239 = vsyncpa [#allocation9], 1 }

</bundles_post_ra>
